<compile_context>
chip_gen: v7x
topology: tpu7x:2x2x1
jax: 0.10.0
libtpu: 0.0.40
codegen_flags: <defaults>
</compile_context>

<pallas_src>
import jax
import jax.numpy as jnp
from jax.experimental import pallas as pl
from jax.experimental.pallas import tpu as pltpu


def _dequant_kernel(x_ref, scale_ref, o_ref):
    # x_ref: (TR, TC) fp8 tile; scale_ref: (TR, 1) f32 per-row scale.
    # Elementwise VPU work: fp8 -> f32, scale, cast to hp dtype.
    x = x_ref[...].astype(jnp.float32)
    o_ref[...] = (x * scale_ref[...]).astype(o_ref.dtype)


def _cdiv(a, b):
    return -(-a // b)


def _select_tiles(BC, HW, target_in_bytes=4 << 20,
                  max_tile_c=16 * 1024, max_tile_r=8 * 1024):
    """Byte-budget tile selection for the [BC, HW] slab.

    Lane (last) axis grows first, in multiples of 128 (or the full dim when it
    already fits); then the sublane axis in multiples of 32 (fp8 packs
    4/sublane, bf16 2/sublane).  Capped tiles are legal for ragged dims: the
    (8,128) rule applies to the block_shape, and Pallas masks edge blocks.
    """
    # --- lane axis ---
    if HW <= 256:
        tile_c = HW                                   # full dim: always legal
    else:
        cap = min(HW, max_tile_c, target_in_bytes)    # 1 byte per fp8 element
        tile_c = max(128, (cap // 128) * 128)
        if tile_c >= HW:
            tile_c = HW
    # --- sublane axis ---
    rows_budget = max(32, target_in_bytes // max(tile_c, 1))
    if BC <= 32:
        tile_r = BC                                   # full dim: always legal
    else:
        cap = min(BC, max_tile_r, rows_budget)
        tile_r = max(32, (cap // 32) * 32)
        if tile_r >= BC:
            tile_r = BC
    return tile_r, tile_c


def _maybe_split_for_megacore(BC, HW, tile_r, tile_c):
    """Ensure >=2 blocks along a parallel axis when the tensor is big enough,
    so v7x's second TensorCore has work (no-op on v5e/v6e)."""
    if _cdiv(BC, tile_r) * _cdiv(HW, tile_c) > 1:
        return tile_r, tile_c
    if BC >= 64:
        half_r = _cdiv(_cdiv(BC, 2), 32) * 32
        if half_r < BC:
            return half_r, tile_c
    if HW >= 256:
        half_c = _cdiv(_cdiv(HW, 2), 128) * 128
        if half_c < HW:
            return tile_r, half_c
    return tile_r, tile_c


def dequant_output(x_nchw, scale, hp_dtype=jnp.bfloat16,
                   target_in_bytes=4 << 20):
    """x_nchw: [B, C, H, W] fp8 (float8_e4m3fn); scale: [C] (or scalar) f32."""
    B, C, H, W = x_nchw.shape
    BC, HW = B * C, H * W

    # Per-channel (axis=1) scale -> per-row scale for the [B*C, H*W] slab.
    s = jnp.asarray(scale, jnp.float32).reshape(-1)
    if s.shape[0] == 1:
        s = jnp.broadcast_to(s, (C,))
    scale_rows = jnp.broadcast_to(s.reshape(1, C), (B, C)).reshape(BC, 1)

    # Free (row-major, no-copy) view: NCHW -> [B*C, H*W].
    x2d = x_nchw.reshape(BC, HW)

    # Tiny-BC fold: (BC, HW) -> (BC*g, HW//g) so packed fp8/bf16 vregs have
    # their sublanes filled and the row grid is non-degenerate.  Only valid
    # splits that keep the lane dim a multiple of 128 are used; the per-row
    # scale is constant across a row, so repeating it g times is exact.
    g = 1
    if BC < 32 and HW >= 256:
        for cand in (2, 4, 8, 16, 32):
            if HW % (cand * 128) != 0:
                break
            g = cand
            if BC * g >= 32:
                break
    if g > 1:
        x2d = x2d.reshape(BC * g, HW // g)
        scale_rows = jnp.repeat(scale_rows, g, axis=0)
    BCe, HWe = BC * g, HW // g

    tile_r, tile_c = _select_tiles(BCe, HWe, target_in_bytes)
    tile_r, tile_c = _maybe_split_for_megacore(BCe, HWe, tile_r, tile_c)

    grid_r = _cdiv(BCe, tile_r)
    grid_c = _cdiv(HWe, tile_c)

    # Put the axis with more blocks first so megacore splitting load-balances.
    if grid_c > grid_r:
        grid = (grid_c, grid_r)
        x_map = lambda j, i: (i, j)
        s_map = lambda j, i: (i, 0)
    else:
        grid = (grid_r, grid_c)
        x_map = lambda i, j: (i, j)
        s_map = lambda i, j: (i, 0)

    out2d = pl.pallas_call(
        _dequant_kernel,
        out_shape=jax.ShapeDtypeStruct((BCe, HWe), hp_dtype),
        grid_spec=pltpu.PrefetchScalarGridSpec(
            num_scalar_prefetch=0,
            grid=grid,
            in_specs=[
                pl.BlockSpec((tile_r, tile_c), x_map),
                # Per-row scale block; block index only changes with the row
                # tile, so the tiny DMA is skipped across the lane-tile loop.
                pl.BlockSpec((tile_r, 1), s_map),
            ],
            out_specs=pl.BlockSpec((tile_r, tile_c), x_map),
        ),
        compiler_params=pltpu.CompilerParams(
            dimension_semantics=("parallel", "parallel"),
            # ~24 MiB double-buffered working set at the 4 MiB fp8 step budget;
            # 48 MiB stays under v7x's 64 MiB/TC and is trivially fine on
            # v5e/v6e (128 MiB physical).
            vmem_limit_bytes=48 * 1024 * 1024,
        ),
    )(x2d, scale_rows)

    # Free view back to NCHW.
    return out2d.reshape(B, C, H, W)


if __name__ == "__main__":
    B, C, H, W = 2, 4, 16, 16
    key = jax.random.PRNGKey(0)
    k_x, k_s = jax.random.split(key)

    # Deterministic fp8 "quantized" input and per-channel (axis=1) scale.
    x_hp = jax.random.normal(k_x, (B, C, H, W), dtype=jnp.float32)
    x_fp8 = x_hp.astype(jnp.float8_e4m3fn)
    scale = jax.random.uniform(k_s, (C,), dtype=jnp.float32) + 0.5

    out = dequant_output(x_fp8, scale, hp_dtype=jnp.bfloat16)
    out = jax.block_until_ready(out)

    # Reference in plain JAX: cast-from-fp8 then per-channel (axis=1) scale.
    ref = (x_fp8.astype(jnp.float32) * scale.reshape(1, C, 1, 1)).astype(jnp.bfloat16)
    assert out.shape == (B, C, H, W) and out.dtype == jnp.bfloat16
    assert jnp.allclose(out.astype(jnp.float32), ref.astype(jnp.float32),
                        atol=1e-2, rtol=1e-2)

    print("KERNEL_OK")
</pallas_src>

<mosaic_0001>
module attributes {stable_mosaic.version = 11 : i64} {
  func.func @_dequant_kernel(%arg0: i32, %arg1: i32, %arg2: memref<16x128xf8E4M3FN, #tpu.memory_space<vmem>>, %arg3: memref<16x1xf32, #tpu.memory_space<vmem>>, %arg4: memref<16x128xbf16, #tpu.memory_space<vmem>>) attributes {dimension_semantics = [#tpu.dimension_semantics<parallel>, #tpu.dimension_semantics<parallel>], iteration_bounds = array<i64: 1, 1>, scalar_prefetch = 0 : i64, scratch_operands = 0 : i64, tpu.core_type = #tpu.core_type<tc>, window_params = [{transform_indices = @transform_0, window_bounds = array<i64: 16, 128>}, {transform_indices = @transform_1, window_bounds = array<i64: 16, 1>}, {transform_indices = @transform_2, window_bounds = array<i64: 16, 128>}]} {
    %c0 = arith.constant 0 : index
    %c0_0 = arith.constant 0 : index
    %0 = vector.load %arg2[%c0, %c0_0] : memref<16x128xf8E4M3FN, #tpu.memory_space<vmem>>, vector<16x128xf8E4M3FN>
    %1 = arith.extf %0 : vector<16x128xf8E4M3FN> to vector<16x128xf32>
    %c0_1 = arith.constant 0 : index
    %c0_2 = arith.constant 0 : index
    %2 = vector.load %arg3[%c0_1, %c0_2] : memref<16x1xf32, #tpu.memory_space<vmem>>, vector<16x1xf32>
    %3 = vector.broadcast %2 : vector<16x1xf32> to vector<16x128xf32>
    %4 = arith.mulf %1, %3 : vector<16x128xf32>
    %5 = arith.truncf %4 : vector<16x128xf32> to vector<16x128xbf16>
    %c0_3 = arith.constant 0 : index
    %c0_4 = arith.constant 0 : index
    %6 = vector.load %arg4[%c0_3, %c0_4] : memref<16x128xbf16, #tpu.memory_space<vmem>>, vector<16x128xbf16>
    tpu.vector_store %arg4[%c0_3, %c0_4], %5 {strides = array<i32>} : memref<16x128xbf16, #tpu.memory_space<vmem>>, vector<16x128xbf16>,
    return
  }
  func.func @transform_0(%arg0: i32, %arg1: i32) -> (i32, i32) {
    %c0_i32 = arith.constant 0 : i32
    return %arg0, %arg1 : i32, i32
  }
  func.func @transform_1(%arg0: i32, %arg1: i32) -> (i32, i32) {
    %c0_i32 = arith.constant 0 : i32
    %c0_i32_0 = arith.constant 0 : i32
    return %arg0, %c0_i32 : i32, i32
  }
  func.func @transform_2(%arg0: i32, %arg1: i32) -> (i32, i32) {
    %c0_i32 = arith.constant 0 : i32
    return %arg0, %arg1 : i32, i32
  }
}

</mosaic_0001>

<bundles_post_ra>
// kernel: tpu_custom_call.1
= control target key start
LH: loop header
LB: loop body
LE: loop exit
PB: predicated region body
PF: predicated region fallthrough
CT: control target
= control target key end

     0   :  { %v98_v1 = vmov 0   ;;  %s138_s0 = inlined_call_operand.vmem [shape: f8e4m3fn[16,128], index: 0, kind: input, shape index: {}]   ;;  %s139_s1 = inlined_call_operand.vmem [shape: f32[16,1], index: 1, kind: input, shape index: {}]   ;;  %s140_s2 = inlined_call_operand.hbm [shape: bf16[16,128], index: 2, kind: output, shape index: {}]  }
   0x1   :  { %v16_v0 = vld [vmem:[%s139_s1] sm:$0xff]  ;;  %73 = vset.pattern.permute.xlu0 %v98_v1 }
   0x2   :  { %7 = vsyncpa [#allocation3], 0  ;;  %20 = vperm.xlu0 %73, %v16_v0   ;;  %v17_v2 = vld [vmem:[%s139_s1 + $0x8] sm:$0xff]  ;;  %v66_v3 = vld [vmem:[%s138_s0] sm:$0xf]   ;;  %s99_s15 = smov [#allocation2]  }
   0x3   :  { %v67_v5 = vunpack.c.0.f8e4m3fn %v66_v3  ;;  %v68_v6 = vunpack.c.1.f8e4m3fn %v66_v3  ;;  %s45_s16 = sshll.u32 %s99_s15, 4  ;;  %s46_s16 = int_to_ptr.vmem [resolvable:$true] %s45_s16 }
   0x4   :  { %s74_s17 = scalar_lea.vmem %s46_s16, 128  ;;  %p79_p1 = scmp.lt.s32.totalorder %s46_s16, %s46_s16 }
   0x5   :  { %p75_p0 = scmp.ne.s32.totalorder %s46_s16, %s74_s17  ;;  %p80_p2 = scmp.lt.s32.totalorder %s74_s17, %s74_s17 }
   0x6   :  { %25 = vperm.xlu0 %73, %v17_v2  }
   0x7   :  { %p81_p3 = por %p80_p2, %p79_p1 }
   0x9   :  { %p82_p4 = pnand %p81_p3, %p75_p0 }
  0x81   :  { %v21_v4 = vpop.permute.xlu0 %20 }
  0x82   :  { %v28_v8 = vmul.f32 %v67_v5, %v21_v4 }
  0x85   :  { %v26_v7 = vpop.permute.xlu0 %25 }
  0x86   :  { %v29_v9 = vmul.f32 %v68_v6, %v26_v7 }
  0x88   :  { %v63_v10 = vpack.c.bf16 %v29_v9, %v28_v8 }
  0x8a   :  { %64 = vst [vmem:[#allocation2] sm:$0xff] %v63_v10  }
  0x8b   :  { %85 = shalt.err (!%p82_p4)
}
  0x8c   :  { %s86_s18 = scalar_lea.hbm %s140_s2, 128 }
  0x8d   :  { %p87_p5 = scmp.ne.s32.totalorder %s140_s2, %s86_s18  ;;  %p90_p6 = scmp.lt.u32.totalorder %s86_s18, %s140_s2 }
  0x8f   :  { %p92_p7 = pnand %p90_p6, %p87_p5 }
  0x91   :  { %95 = shalt.err (!%p92_p7)
}
  0x92   :  { %s100_s23 = smov 64   ;;  %s101_s24 = smov 4  }
  0x93   :  { %51 = dma.vmem_to_hbm [thread:$0]  %s46_s16, 128, %s140_s2, [#allocation3], %s100_s23, %s100_s23, %s101_s24  }
  0x94   :  { %96 = dma.done.wait [#allocation3], 128  }
  0x95   :  { %97 = vsyncadd [#allocation3], 4294967168 }
  0x96   :  { %55 = vsyncpa [#allocation3], 1 }

</bundles_post_ra>
